<compile_context>
chip_gen: v7x
topology: tpu7x:2x2x1
jax: 0.10.0
libtpu: 0.0.40
codegen_flags: <defaults>
</compile_context>

<pallas_src>
import jax
import jax.numpy as jnp
from jax.experimental import pallas as pl
from jax.experimental.pallas import tpu as pltpu

SMOOTH = 1.0

_LANES = 128
_SUBLANES = 8
# Per-grid-step input byte budget (pred all channels + target channel 0).
_STEP_BYTE_BUDGET = 4 * 1024 * 1024
_MAX_TILE_ROWS = 4096
# > v5e's 16 MiB scoped default, <= v7x's 64 MiB physical.
_VMEM_LIMIT_BYTES = 32 * 1024 * 1024


def _pick_tile_rows(rows, c, itemsize):
    """Rows (of 128 lanes) per grid step: multiple of 8, sized from a byte budget."""
    per_row = (c + 1) * _LANES * itemsize          # pred (all C) + target chan 0
    tr = max(_SUBLANES, (_STEP_BYTE_BUDGET // per_row) // _SUBLANES * _SUBLANES)
    tr = min(tr, _MAX_TILE_ROWS)
    rows_up = pl.cdiv(rows, _SUBLANES) * _SUBLANES
    return min(tr, rows_up)


def binary_dice_loss(pred, targets, *, tile_rows=None):
    """JAX/Pallas equivalent of BinaryDiceLoss.forward (returns a scalar).

    pred, targets: (N, C, H, W).  pred may be f32 or bf16; targets may be any
    dtype holding the 0/1 mask in channel 0 (other channels are ignored, as in
    the PyTorch module).
    """
    n, c, h, w = pred.shape
    assert pred.shape == targets.shape
    hw = h * w

    rows = pl.cdiv(hw, _LANES)
    itemsize = jnp.dtype(pred.dtype).itemsize
    if tile_rows is None:
        tile_rows = _pick_tile_rows(rows, c, itemsize)
    assert tile_rows % _SUBLANES == 0
    num_k = pl.cdiv(rows, tile_rows)
    rows_pad = num_k * tile_rows
    hw_pad = rows_pad * _LANES

    pred3 = pred.reshape(n, c, hw)
    tgt3 = targets.reshape(n, c, hw)
    if hw_pad != hw:
        # Zero-pad; padded lanes are masked out of the sums inside the kernel.
        pad = ((0, 0), (0, 0), (0, hw_pad - hw))
        pred3 = jnp.pad(pred3, pad)
        tgt3 = jnp.pad(tgt3, pad)
    pred4 = pred3.reshape(n, c, rows_pad, _LANES)
    tgt4 = tgt3.reshape(n, c, rows_pad, _LANES)

    masked = hw_pad != hw  # trace-time constant

    def kernel(pred_ref, tgt_ref, dice_ref, inter_acc, denom_acc):
        k = pl.program_id(1)

        @pl.when(k == 0)
        def _init():
            inter_acc[...] = jnp.zeros_like(inter_acc)
            denom_acc[...] = jnp.zeros_like(denom_acc)

        x = pred_ref[...].astype(jnp.float32)      # (C, TR, 128)
        t0 = tgt_ref[...].astype(jnp.float32)      # (TR, 128) -- channel 0 only

        if c == 2:
            # softmax over 2 channels, channel 0  ==  sigmoid(x0 - x1)
            p0 = 1.0 / (1.0 + jnp.exp(x[1] - x[0]))
        else:
            # Channel axis is a major axis -> max/exp/sum are plain VPU vreg ops.
            m = jnp.max(x, axis=0)
            e = jnp.exp(x - m)
            p0 = e[0] / jnp.sum(e, axis=0)

        if masked:
            row0 = k * tile_rows
            ridx = jax.lax.broadcasted_iota(jnp.int32, (tile_rows, _LANES), 0)
            cidx = jax.lax.broadcasted_iota(jnp.int32, (tile_rows, _LANES), 1)
            elem = (ridx + row0) * _LANES + cidx
            valid = (elem < hw).astype(jnp.float32)
            p0 = p0 * valid
            t0 = t0 * valid

        # Deferred cross-lane reduction: fold the row-tile into (8, 128) lane
        # partials with pure VPU adds (reduce over the vreg-major axis only).
        p0r = p0.reshape(tile_rows // _SUBLANES, _SUBLANES, _LANES)
        t0r = t0.reshape(tile_rows // _SUBLANES, _SUBLANES, _LANES)
        inter_acc[...] += jnp.sum(p0r * t0r, axis=0)
        denom_acc[...] += jnp.sum(p0r + t0r, axis=0)   # fused pred-sum + target-sum

        @pl.when(k == pl.num_programs(1) - 1)
        def _finalize():
            inter = jnp.sum(inter_acc[...], axis=(0, 1), keepdims=True)   # (1, 1)
            denom = jnp.sum(denom_acc[...], axis=(0, 1), keepdims=True)   # (1, 1)
            dice = (2.0 * inter + SMOOTH) / (denom + SMOOTH)
            dice_ref[...] = jnp.broadcast_to(dice, (_SUBLANES, _LANES))

    dice = pl.pallas_call(
        kernel,
        out_shape=jax.ShapeDtypeStruct((n, _SUBLANES, _LANES), jnp.float32),
        grid_spec=pltpu.PrefetchScalarGridSpec(
            num_scalar_prefetch=0,
            grid=(n, num_k),
            in_specs=[
                # pred: one sample, all channels, one row-tile.
                pl.BlockSpec((None, c, tile_rows, _LANES),
                             lambda b, k: (b, 0, k, 0)),
                # targets: one sample, CHANNEL 0 ONLY, one row-tile (the DMA
                # reads only channel-0 bytes straight from HBM).
                pl.BlockSpec((None, None, tile_rows, _LANES),
                             lambda b, k: (b, 0, k, 0)),
            ],
            out_specs=pl.BlockSpec((None, _SUBLANES, _LANES),
                                   lambda b, k: (b, 0, 0)),
            scratch_shapes=[
                pltpu.VMEM((_SUBLANES, _LANES), jnp.float32),  # intersection partials
                pltpu.VMEM((_SUBLANES, _LANES), jnp.float32),  # pred+target partials
            ],
        ),
        compiler_params=pltpu.CompilerParams(
            dimension_semantics=("parallel", "arbitrary"),
            vmem_limit_bytes=_VMEM_LIMIT_BYTES,
        ),
    )(pred4, tgt4)

    dice_per_sample = dice[:, 0, 0]                      # (N,)
    return 1.0 - jnp.sum(dice_per_sample) / n


def _binary_dice_loss_ref(pred, targets):
    """Pure-JAX reference of the PyTorch module (computed in f32)."""
    n = pred.shape[0]
    p = jax.nn.softmax(pred.astype(jnp.float32), axis=1)[:, 0].reshape(n, -1)
    t = targets[:, 0].astype(jnp.float32).reshape(n, -1)
    inter = jnp.sum(p * t, axis=1)
    dice = (2.0 * inter + SMOOTH) / (jnp.sum(p, axis=1) + jnp.sum(t, axis=1) + SMOOTH)
    return 1.0 - jnp.sum(dice) / n


if __name__ == "__main__":
    key = jax.random.PRNGKey(0)
    k1, k2, k3, k4 = jax.random.split(key, 4)
    N = 2

    def make(c, h, w, kk):
        ka, kb = jax.random.split(kk)
        logits = jax.random.normal(ka, (N, c, h, w), dtype=jnp.float32)
        mask = jax.random.bernoulli(kb, 0.5, (N, h, w)).astype(jnp.float32)
        tgt = jnp.concatenate(
            [mask[:, None], 1.0 - mask[:, None],
             jnp.zeros((N, c - 2, h, w), jnp.float32)], axis=1)
        return logits, tgt

    p2a, t2a = make(2, 16, 16, k1)   # C==2, hw=256: single step, masked tail
    p2b, t2b = make(2, 32, 32, k2)   # C==2, hw=1024: exact tiling, no mask
    p2c, t2c = make(2, 48, 48, k3)   # C==2, hw=2304: multi-step + masked tail
    p4, t4 = make(4, 16, 16, k4)     # C==4: general softmax path

    cases = [
        (p2a, t2a, None, 1e-5),
        (p2b, t2b, None, 1e-5),
        (p2c, t2c, 8, 1e-5),                          # force multi-step grid
        (p4, t4, None, 1e-5),
        (p2b.astype(jnp.bfloat16), t2b, None, 2e-3),  # bf16 logits in HBM
    ]

    for pred, tgt, tr, tol in cases:
        got = binary_dice_loss(pred, tgt, tile_rows=tr)
        jax.block_until_ready(got)
        want = _binary_dice_loss_ref(pred, tgt)
        assert abs(float(got) - float(want)) < tol, (pred.shape, float(got), float(want))

    print("KERNEL_OK")
</pallas_src>

<mosaic_0001>
module attributes {stable_mosaic.version = 11 : i64} {
  func.func @kernel(%arg0: i32, %arg1: i32, %arg2: memref<1x2x8x128xf32, #tpu.memory_space<vmem>>, %arg3: memref<1x1x8x128xf32, #tpu.memory_space<vmem>>, %arg4: memref<1x8x128xf32, #tpu.memory_space<vmem>>, %arg5: memref<8x128xf32, #tpu.memory_space<vmem>>, %arg6: memref<8x128xf32, #tpu.memory_space<vmem>>) attributes {dimension_semantics = [#tpu.dimension_semantics<parallel>, #tpu.dimension_semantics<arbitrary>], iteration_bounds = array<i64: 2, 1>, scalar_prefetch = 0 : i64, scratch_operands = 2 : i64, tpu.core_type = #tpu.core_type<tc>, window_params = [{transform_indices = @transform_0, window_bounds = array<i64: 1, 2, 8, 128>}, {transform_indices = @transform_1, window_bounds = array<i64: 1, 1, 8, 128>}, {transform_indices = @transform_2, window_bounds = array<i64: 1, 8, 128>}]} {
    %c0_i32 = arith.constant 0 : i32
    %0 = arith.cmpi eq, %arg1, %c0_i32 : i32
    %1 = arith.extui %0 : i1 to i32
    %c0_i32_0 = arith.constant 0 : i32
    %2 = arith.cmpi ne, %1, %c0_i32_0 : i32
    scf.if %2 {
      %cst_21 = arith.constant 0.000000e+00 : f32
      %46 = vector.broadcast %cst_21 : f32 to vector<8x128xf32>
      %c0_22 = arith.constant 0 : index
      %c0_23 = arith.constant 0 : index
      %47 = vector.load %arg5[%c0_22, %c0_23] : memref<8x128xf32, #tpu.memory_space<vmem>>, vector<8x128xf32>
      tpu.vector_store %arg5[%c0_22, %c0_23], %46 {strides = array<i32>} : memref<8x128xf32, #tpu.memory_space<vmem>>, vector<8x128xf32>,
      %cst_24 = arith.constant 0.000000e+00 : f32
      %48 = vector.broadcast %cst_24 : f32 to vector<8x128xf32>
      %c0_25 = arith.constant 0 : index
      %c0_26 = arith.constant 0 : index
      %49 = vector.load %arg6[%c0_25, %c0_26] : memref<8x128xf32, #tpu.memory_space<vmem>>, vector<8x128xf32>
      tpu.vector_store %arg6[%c0_25, %c0_26], %48 {strides = array<i32>} : memref<8x128xf32, #tpu.memory_space<vmem>>, vector<8x128xf32>,
    } else {
    }
    %c0 = arith.constant 0 : index
    %c0_1 = arith.constant 0 : index
    %c0_2 = arith.constant 0 : index
    %c0_3 = arith.constant 0 : index
    %3 = vector.load %arg2[%c0, %c0_1, %c0_2, %c0_3] : memref<1x2x8x128xf32, #tpu.memory_space<vmem>>, vector<1x2x8x128xf32>
    %4 = vector.shape_cast %3 : vector<1x2x8x128xf32> to vector<2x8x128xf32>
    %c0_4 = arith.constant 0 : index
    %c0_5 = arith.constant 0 : index
    %c0_6 = arith.constant 0 : index
    %c0_7 = arith.constant 0 : index
    %5 = vector.load %arg3[%c0_4, %c0_5, %c0_6, %c0_7] : memref<1x1x8x128xf32, #tpu.memory_space<vmem>>, vector<1x1x8x128xf32>
    %6 = vector.shape_cast %5 : vector<1x1x8x128xf32> to vector<8x128xf32>
    %7 = vector.extract_strided_slice %4 {offsets = [1, 0, 0], sizes = [1, 8, 128], strides = [1, 1, 1]} : vector<2x8x128xf32> to vector<1x8x128xf32>
    %8 = vector.shape_cast %7 : vector<1x8x128xf32> to vector<8x128xf32>
    %9 = vector.extract_strided_slice %4 {offsets = [0, 0, 0], sizes = [1, 8, 128], strides = [1, 1, 1]} : vector<2x8x128xf32> to vector<1x8x128xf32>
    %10 = vector.shape_cast %9 : vector<1x8x128xf32> to vector<8x128xf32>
    %11 = arith.subf %8, %10 : vector<8x128xf32>
    %12 = math.exp %11 : vector<8x128xf32>
    %cst = arith.constant 1.000000e+00 : f32
    %13 = vector.broadcast %cst : f32 to vector<8x128xf32>
    %14 = arith.addf %13, %12 : vector<8x128xf32>
    %cst_8 = arith.constant 1.000000e+00 : f32
    %15 = vector.broadcast %cst_8 : f32 to vector<8x128xf32>
    %16 = arith.divf %15, %14 : vector<8x128xf32>
    %c8_i32 = arith.constant 8 : i32
    %17 = arith.muli %arg1, %c8_i32 : i32
    %18 = tpu.iota {dimensions = array<i32: 0>} : vector<8x128xi32>
    %19 = tpu.iota {dimensions = array<i32: 1>} : vector<8x128xi32>
    %20 = vector.broadcast %17 : i32 to vector<8x128xi32>
    %21 = arith.addi %18, %20 : vector<8x128xi32>
    %c128_i32 = arith.constant 128 : i32
    %22 = vector.broadcast %c128_i32 : i32 to vector<8x128xi32>
    %23 = arith.muli %21, %22 : vector<8x128xi32>
    %24 = arith.addi %23, %19 : vector<8x128xi32>
    %c256_i32 = arith.constant 256 : i32
    %25 = vector.broadcast %c256_i32 : i32 to vector<8x128xi32>
    %26 = arith.cmpi slt, %24, %25 : vector<8x128xi32>
    %27 = arith.extui %26 : vector<8x128xi1> to vector<8x128xi32>
    %28 = arith.sitofp %27 : vector<8x128xi32> to vector<8x128xf32>
    %29 = arith.mulf %16, %28 : vector<8x128xf32>
    %30 = arith.mulf %6, %28 : vector<8x128xf32>
    %31 = vector.shape_cast %29 : vector<8x128xf32> to vector<1x8x128xf32>
    %32 = vector.shape_cast %30 : vector<8x128xf32> to vector<1x8x128xf32>
    %c0_9 = arith.constant 0 : index
    %c0_10 = arith.constant 0 : index
    %33 = vector.load %arg5[%c0_9, %c0_10] : memref<8x128xf32, #tpu.memory_space<vmem>>, vector<8x128xf32>
    %34 = arith.mulf %31, %32 : vector<1x8x128xf32>
    %cst_11 = arith.constant dense<0.000000e+00> : vector<8x128xf32>
    %35 = vector.multi_reduction <add>, %34, %cst_11 [0] : vector<1x8x128xf32> to vector<8x128xf32>
    %36 = arith.addf %33, %35 : vector<8x128xf32>
    %c0_12 = arith.constant 0 : index
    %c0_13 = arith.constant 0 : index
    %37 = vector.load %arg5[%c0_12, %c0_13] : memref<8x128xf32, #tpu.memory_space<vmem>>, vector<8x128xf32>
    tpu.vector_store %arg5[%c0_12, %c0_13], %36 {strides = array<i32>} : memref<8x128xf32, #tpu.memory_space<vmem>>, vector<8x128xf32>,
    %c0_14 = arith.constant 0 : index
    %c0_15 = arith.constant 0 : index
    %38 = vector.load %arg6[%c0_14, %c0_15] : memref<8x128xf32, #tpu.memory_space<vmem>>, vector<8x128xf32>
    %39 = arith.addf %31, %32 : vector<1x8x128xf32>
    %cst_16 = arith.constant dense<0.000000e+00> : vector<8x128xf32>
    %40 = vector.multi_reduction <add>, %39, %cst_16 [0] : vector<1x8x128xf32> to vector<8x128xf32>
    %41 = arith.addf %38, %40 : vector<8x128xf32>
    %c0_17 = arith.constant 0 : index
    %c0_18 = arith.constant 0 : index
    %42 = vector.load %arg6[%c0_17, %c0_18] : memref<8x128xf32, #tpu.memory_space<vmem>>, vector<8x128xf32>
    tpu.vector_store %arg6[%c0_17, %c0_18], %41 {strides = array<i32>} : memref<8x128xf32, #tpu.memory_space<vmem>>, vector<8x128xf32>,
    %c0_i32_19 = arith.constant 0 : i32
    %43 = arith.cmpi eq, %arg1, %c0_i32_19 : i32
    %44 = arith.extui %43 : i1 to i32
    %c0_i32_20 = arith.constant 0 : i32
    %45 = arith.cmpi ne, %44, %c0_i32_20 : i32
    scf.if %45 {
      %c0_21 = arith.constant 0 : index
      %c0_22 = arith.constant 0 : index
      %46 = vector.load %arg5[%c0_21, %c0_22] : memref<8x128xf32, #tpu.memory_space<vmem>>, vector<8x128xf32>
      %47 = vector.shape_cast %46 : vector<8x128xf32> to vector<1x8x128xf32>
      %cst_23 = arith.constant dense<0.000000e+00> : vector<1xf32>
      %48 = vector.multi_reduction <add>, %47, %cst_23 [1, 2] : vector<1x8x128xf32> to vector<1xf32>
      %49 = vector.shape_cast %48 : vector<1xf32> to vector<1x1x1xf32>
      %50 = vector.extract %49[0, 0, 0] : f32 from vector<1x1x1xf32>
      %51 = vector.broadcast %50 : f32 to vector<1x1xf32>
      %c0_24 = arith.constant 0 : index
      %c0_25 = arith.constant 0 : index
      %52 = vector.load %arg6[%c0_24, %c0_25] : memref<8x128xf32, #tpu.memory_space<vmem>>, vector<8x128xf32>
      %53 = vector.shape_cast %52 : vector<8x128xf32> to vector<1x8x128xf32>
      %cst_26 = arith.constant dense<0.000000e+00> : vector<1xf32>
      %54 = vector.multi_reduction <add>, %53, %cst_26 [1, 2] : vector<1x8x128xf32> to vector<1xf32>
      %55 = vector.shape_cast %54 : vector<1xf32> to vector<1x1x1xf32>
      %56 = vector.extract %55[0, 0, 0] : f32 from vector<1x1x1xf32>
      %57 = vector.broadcast %56 : f32 to vector<1x1xf32>
      %cst_27 = arith.constant 2.000000e+00 : f32
      %58 = vector.broadcast %cst_27 : f32 to vector<1x1xf32>
      %59 = arith.mulf %58, %51 : vector<1x1xf32>
      %cst_28 = arith.constant 1.000000e+00 : f32
      %60 = vector.broadcast %cst_28 : f32 to vector<1x1xf32>
      %61 = arith.addf %59, %60 : vector<1x1xf32>
      %cst_29 = arith.constant 1.000000e+00 : f32
      %62 = vector.broadcast %cst_29 : f32 to vector<1x1xf32>
      %63 = arith.addf %57, %62 : vector<1x1xf32>
      %64 = arith.divf %61, %63 : vector<1x1xf32>
      %65 = vector.shape_cast %64 : vector<1x1xf32> to vector<1x1xf32>
      %66 = vector.broadcast %65 : vector<1x1xf32> to vector<8x128xf32>
      %c0_30 = arith.constant 0 : index
      %c0_31 = arith.constant 0 : index
      %c0_32 = arith.constant 0 : index
      %67 = vector.load %arg4[%c0_30, %c0_31, %c0_32] : memref<1x8x128xf32, #tpu.memory_space<vmem>>, vector<1x8x128xf32>
      %68 = vector.shape_cast %67 : vector<1x8x128xf32> to vector<8x128xf32>
      %69 = vector.shape_cast %66 : vector<8x128xf32> to vector<1x8x128xf32>
      tpu.vector_store %arg4[%c0_30, %c0_31, %c0_32], %69 {strides = array<i32>} : memref<1x8x128xf32, #tpu.memory_space<vmem>>, vector<1x8x128xf32>,
    } else {
    }
    return
  }
  func.func @transform_0(%arg0: i32, %arg1: i32) -> (i32, i32, i32, i32) {
    %c0_i32 = arith.constant 0 : i32
    %c0_i32_0 = arith.constant 0 : i32
    %c0_i32_1 = arith.constant 0 : i32
    return %arg0, %c0_i32, %arg1, %c0_i32_0 : i32, i32, i32, i32
  }
  func.func @transform_1(%arg0: i32, %arg1: i32) -> (i32, i32, i32, i32) {
    %c0_i32 = arith.constant 0 : i32
    %c0_i32_0 = arith.constant 0 : i32
    %c0_i32_1 = arith.constant 0 : i32
    return %arg0, %c0_i32, %arg1, %c0_i32_0 : i32, i32, i32, i32
  }
  func.func @transform_2(%arg0: i32, %arg1: i32) -> (i32, i32, i32) {
    %c0_i32 = arith.constant 0 : i32
    %c0_i32_0 = arith.constant 0 : i32
    %c0_i32_1 = arith.constant 0 : i32
    return %arg0, %c0_i32, %c0_i32_0 : i32, i32, i32
  }
}

</mosaic_0001>

<bundles_post_ra>
// kernel: tpu_custom_call.1
= control target key start
LH: loop header
LB: loop body
LE: loop exit
PB: predicated region body
PF: predicated region fallthrough
CT: control target
= control target key end

     0   :  { %7 = vsyncpa [#allocation5], 0  ;;  %s899_s0 = inlined_call_operand.hbm [shape: f32[2,2,8,128], index: 0, kind: input, shape index: {}]   ;;  %s900_s1 = inlined_call_operand.hbm [shape: f32[2,2,8,128], index: 1, kind: input, shape index: {}]   ;;  %s901_s2 = inlined_call_operand.hbm [shape: f32[2,8,128], index: 2, kind: output, shape index: {}]  }
   0x1   :  { %9 = vsyncpa [#allocation5 + $0x1], 0 }
   0x2   :  { %10 = vsyncpa [#allocation8], 0 }
   0x3   :  { %12 = vsyncpa [#allocation8 + $0x1], 0 }
   0x4   :  { %13 = vsyncpa [#allocation6], 0 }
   0x5   :  { %15 = vsyncpa [#allocation6 + $0x1], 0  ;;  %s677_s9 = smov 0   ;;  %s679_s10 = smov 0  }
   0x6   :  { %s681_s11 = smov 0   ;;  %s683_s12 = smov 0  }
   0x7   :  { %s685_s13 = smov 0   ;;  %s687_s14 = smov 0  }
   0x8 LB: > { %s407_s15 = sadd.s32 4294967295, %s654_s14   ;;  %s408_s16 = sadd.s32 4294967294, %s654_s14   ;;  %s654_s14 = sphi %s687_s14, %s21_s14   ;;  %s650_s13 = sphi %s685_s13, %s920_s13   ;;  %s646_s12 = sphi %s683_s12, %s919_s12   ;;  %s642_s11 = sphi %s681_s11, %s918_s11   ;;  %s638_s10 = sphi %s679_s10, %s917_s10   ;;  %s634_s9 = sphi %s677_s9, %s916_s9  }
   0x9   : > { %s33_s17 = sadd.s32 1, %s650_s13  ;;  %s42_s18 = sadd.s32 1, %s642_s11 }
   0xa   : > { %p35_p0 = scmp.ge.s32.totalorder %s33_s17, 2  ;;  %p49_p1 = scmp.ne.s32.totalorder %s642_s11, %s638_s10 }
   0xb   : > { %p50_p2 = scmp.eq.s32.totalorder %s654_s14, 0  ;;  %p55_p3 = scmp.ne.s32.totalorder %s638_s10, %s634_s9 }
   0xc   : > { %s922_s17 = smov (%p35_p0, %s33_s17), 0  ;;  %p56_p5 = scmp.eq.s32.totalorder %s407_s15, 0 }
   0xd   : > { %p718_p4 = por %p50_p2, %p49_p1  ;;  %s37_s20 = ssub.s32 %s650_s13, %s922_s17 }
   0xe   : > { %p107_p6 = scmp.eq.s32.totalorder %s407_s15, 1  ;;  %p40_p7 = scmp.eq.s32.totalorder %s37_s20, 0 }
   0xf   : > { %p724_p8 = por %p56_p5, %p55_p3  ;;  %p113_p10 = scmp.eq.s32.totalorder %s408_s16, 1 }
  0x10   : > { %p728_p9 = por %p107_p6, %p49_p1  ;;  %p449_p13 = scmp.lt.s32.totalorder %s654_s14, 2 }
  0x11   : > { %s905_s21 = scalar_select %p724_p8, 1, 0 }
  0x12   : > { %s906_s22 = scalar_select %p728_p9, 1, 0 }
  0x13   : > { %s733_s23 = scalar_select %p40_p7, %s642_s11, %s42_s18  }
  0x14   : > { %p735_p11 = por %p113_p10, %p55_p3  ;;  %s742_s25 = sand.u32 1, %s642_s11  }
  0x15   : > { %s411_s26 = sshll.u32 %s742_s25, 4  ;;  %s426_s27 = sshll.u32 %s650_s13, 8 }
  0x16   : > { %s907_s24 = scalar_select %p735_p11, 1, 0 }
  0x17   : > { %s751_s30 = scalar_lea.hbm %s899_s0, %s426_s27  ;;  %s137_s3 = scalar_lea.vmem [#allocation4], %s411_s26 }
  0x18   : > { %s145_s4 = sshll.u32 %s137_s3, 4  ;;  %p757_p0 = pnand %p449_p13, %p718_p4  ;;  %s753_s4 = int_to_ptr.vmem [resolvable:$true] %s145_s4 }
  0x19   : > { %s134_s6 = scalar_lea.sflag [#allocation5], %s742_s25  ;;  %s508_s7 = scalar_lea.hbm %s751_s30, 256 }
  0x1a   : > { %p509_p2 = scmp.ne.s32.totalorder %s751_s30, %s508_s7  ;;  %p510_p3 = pneg %p757_p0 }
  0x1b   : > { %s513_s16 = scalar_lea.hbm %s899_s0, 512  ;;  %p514_p4 = scmp.lt.u32.totalorder %s751_s30, %s899_s0 }
  0x1c   : > { %p511_p5 = pnand %p510_p3, %p509_p2  ;;  %p515_p7 = scmp.lt.u32.totalorder %s513_s16, %s508_s7 }
  0x1d   : > { %p517_p13 = scmp.lt.u32.totalorder %s508_s7, %s751_s30 }
  0x1e   : > { %p512_p6 = pneg %p511_p5  ;;  %p516_p10 = por %p515_p7, %p514_p4 }
  0x20   : > { %p518_p12 = por %p517_p13, %p516_p10 }
  0x22   : > { %p519_p1 = pnand %p518_p12, %p512_p6 }
  0x24   : > { %522 = shalt.err (!%p519_p1)
}
  0x25   : > { %s523_s20 = scalar_lea.vmem %s753_s4, 256  ;;  %s656_s26 = smov [#allocation4]  }
  0x26   : > { %p524_p2 = scmp.ne.s32.totalorder %s753_s4, %s523_s20  ;;  %s528_s28 = sshll.u32 %s656_s26, 4  ;;  %s529_s28 = int_to_ptr.vmem [resolvable:$false] %s528_s28 }
  0x27   : > { %s530_s29 = scalar_lea.vmem %s529_s28, 512  ;;  %p531_p9 = scmp.lt.s32.totalorder %s753_s4, %s529_s28 }
  0x28   : > { %p526_p5 = pnand %p524_p2, %p510_p3  ;;  %p532_p4 = scmp.lt.s32.totalorder %s530_s29, %s523_s20 }
  0x2a   : > { %p527_p11 = pneg %p526_p5  ;;  %p533_p7 = por %p532_p4, %p531_p9 }
  0x2c   : > { %p534_p10 = pnand %p533_p7, %p527_p11 }
  0x2e   : > { %537 = shalt.err (!%p534_p10)
}
  0x2f   : > { %s657_s3 = smov 128   ;;  %s658_s7 = smov 8  }
  0x30   : > { %441 = dma.hbm_to_vmem [thread:$0]  (!%p757_p0), %s751_s30, 256, %s753_s4, %s134_s6, %s657_s3, %s657_s3, %s658_s7  }
  0x31   : > { %p173_p12 = scmp.lt.s32.totalorder %s654_s14, 3  ;;  %s414_s8 = sshll.u32 %s742_s25, 3 }
  0x32   : > { %s797_s18 = scalar_lea.hbm %s900_s1, %s426_s27  ;;  %p909_p9 = scmp.ge.s32.totalorder %s654_s14, 1 }
  0x33   : > { %s159_s20 = scalar_lea.vmem [#allocation7], %s414_s8  ;;  %s156_s30 = scalar_lea.sflag [#allocation8], %s742_s25 }
  0x34   : > { %p801_p11 = pnand %p909_p9, %p173_p12  ;;  %s168_s26 = sshll.u32 %s159_s20, 4  ;;  %s169_s26 = int_to_ptr.vmem [resolvable:$true] %s168_s26 }
  0x35   : > { %s538_s4 = scalar_lea.hbm %s797_s18, 128  ;;  %s543_s28 = scalar_lea.hbm %s900_s1, 512 }
  0x36   : > { %s910_s19 = scalar_select %p801_p11, 1, 0 }
  0x37   : > { %p539_p1 = scmp.ne.s32.totalorder %s797_s18, %s538_s4  ;;  %p544_p2 = scmp.lt.u32.totalorder %s797_s18, %s900_s1 }
  0x38   : > { %p545_p5 = scmp.lt.u32.totalorder %s543_s28, %s538_s4  ;;  %p547_p7 = scmp.lt.u32.totalorder %s538_s4, %s797_s18 }
  0x39   : > { %p541_p6 = pnand %p539_p1, %p510_p3 }
  0x3a   : > { %p546_p4 = por %p545_p5, %p544_p2 }
  0x3b   : > { %p542_p13 = pneg %p541_p6 }
  0x3c   : > { %p548_p10 = por %p547_p7, %p546_p4 }
  0x3e   : > { %p549_p12 = pnand %p548_p10, %p542_p13 }
  0x40   : > { %552 = shalt.err (!%p549_p12)
}
  0x41   : > { %s553_s25 = scalar_lea.vmem %s169_s26, 128  ;;  %s659_s7 = smov [#allocation7]  }
  0x42   : > { %p554_p9 = scmp.ne.s32.totalorder %s169_s26, %s553_s25  ;;  %s558_s8 = sshll.u32 %s659_s7, 4  ;;  %s559_s8 = int_to_ptr.vmem [resolvable:$false] %s558_s8 }
  0x43   : > { %s560_s15 = scalar_lea.vmem %s559_s8, 256  ;;  %p561_p8 = scmp.lt.s32.totalorder %s169_s26, %s559_s8 }
  0x44   : > { %p556_p1 = pnand %p554_p9, %p510_p3  ;;  %p562_p11 = scmp.lt.s32.totalorder %s560_s15, %s553_s25 }
  0x46   : > { %p557_p6 = pneg %p556_p1  ;;  %p563_p2 = por %p562_p11, %p561_p8 }
  0x48   : > { %p564_p5 = pnand %p563_p2, %p557_p6 }
  0x4a   : > { %567 = shalt.err (!%p564_p5)
}
  0x4b   : > { %444 = dma.hbm_to_vmem [thread:$0]  (!%p757_p0), %s797_s18, 128, %s169_s26, %s156_s30  }
  0x4c   : > { %p911_p13 = scmp.ne.s32.totalorder %s910_s19, 0 }
  0x4d   : > { %s828_s16 = sand.u32 (!%p911_p13), 1, %s638_s10   ;;  %p912_p3 = scmp.ne.s32.totalorder (!%p911_p13), %s905_s21, 0 }
  0x4e   : > { %177 = sbr.rel (%p911_p13) target bundleno = 360 (0x168), region = 28  ;;  %s418_s20 = sshll.u32 (!%p911_p13), %s828_s16, 4 }
  0x4f   : > { %s180_s4 = scalar_lea.sflag (!%p911_p13), [#allocation5], %s828_s16  ;;  %s183_s27 = scalar_lea.vmem (!%p911_p13), [#allocation4], %s418_s20 }
  0x55   : > { %621 = dma.done.wait (%p912_p3), %s180_s4, 256  }
  0x56   : > { %623 = vsyncadd (%p912_p3), %s180_s4, 4294967040  ;;  %s419_s5 = sshll.u32 %s828_s16, 3  ;;  %s189_s18 = scalar_lea.sflag [#allocation8], %s828_s16 }
  0x57   : > { %s192_s19 = scalar_lea.vmem [#allocation7], %s419_s5 }
  0x58   : > { %625 = dma.done.wait (%p912_p3), %s189_s18, 128  }
  0x59   : > { %627 = vsyncadd (%p912_p3), %s189_s18, 4294967168  ;;  %v224_v0 = vld [vmem:[%s183_s27] sm:$0xff]  ;;  %v225_v1 = vld [vmem:[%s183_s27 + $0x8] sm:$0xff]  ;;  %v234_v4 = vlaneseq  ;;  %v660_v12 = vmov 0.0   ;;  %s423_s30 = sshll.u32 %s646_s12, 7  ;;  %s217_s6 = scalar_lea.vmem [#allocation9], %s419_s5 }
  0x5a   : > { %v227_v2 = vsub.f32 %v225_v1, %v224_v0  ;;  %v226_v11 = vld [vmem:[%s192_s19] sm:$0xff]  ;;  %s302_s28 = sshll.u32 %s217_s6, 4  ;;  %s850_s25 = scalar_lea.hbm %s901_s2, %s423_s30  ;;  %s852_s28 = int_to_ptr.vmem [resolvable:$true] %s302_s28 }
  0x5b   : > { %v235_v5 = vshrl.u32 %v234_v4, 7  ;;  %v237_v6 = vand.u32 127, %v234_v4  ;;  %s289_s7 = scalar_lea.sflag [#allocation6], %s828_s16  ;;  %s568_s8 = scalar_lea.vmem %s852_s28, 128 }
  0x5c   : > { %v228_v3 = vmul.f32 1.442695, %v227_v2  ;;  %p569_p8 = scmp.ne.s32.totalorder %s852_s28, %s568_s8  ;;  %p913_p0 = scmp.ne.s32.totalorder %s906_s22, 0 }
  0x5d   : > { %v240_v7 = vmul.u32 128, %v235_v5  ;;  %s661_s12 = smov [#allocation9]  }
  0x5e   : > { %502 = vpow2.f32 %v228_v3  ;;  %p570_p11 = pnand %p569_p8, %p913_p0  ;;  %s572_s15 = sshll.u32 %s661_s12, 4  ;;  %s573_s15 = int_to_ptr.vmem [resolvable:$false] %s572_s15 }
  0x5f   : > { %v241_v10 = vadd.s32 %v240_v7, %v237_v6  ;;  %s574_s20 = scalar_lea.vmem %s573_s15, 256  ;;  %p575_p7 = scmp.lt.s32.totalorder %s852_s28, %s573_s15 }
  0x60   : > { %p571_p4 = pneg %p570_p11  ;;  %p576_p10 = scmp.lt.s32.totalorder %s574_s20, %s568_s8 }
  0x61   : > { %vm242_vm0 = vcmp.lt.s32.totalorder %v241_v10, 256 }
  0x62   : > { %v421_v13 = vsel %vm242_vm0, 1.0, %v660_v12  ;;  %p577_p12 = por %p576_p10, %p575_p7 }
  0x63   : > { %v246_v14 = vmul.f32 %v421_v13, %v226_v11 }
  0x64   : > { %p578_p9 = pnand %p577_p12, %p571_p4 }
  0x68   : > { %v503_v8 = vpop.eup %502 }
  0x69   : > { %v230_v9 = vadd.f32 1.0, %v503_v8 }
  0x6b   : > { %504 = vrcp.f32 %v230_v9 }
  0x75   : > { %v505_v15 = vpop.eup %504 }
  0x76   : > { %v245_v16 = vmul.f32 %v505_v15, %v421_v13 }
  0x78   : > { %v248_v17 = vmul.f32 %v246_v14, %v245_v16  ;;  %v253_v18 = vadd.f32 %v246_v14, %v245_v16 }
  0x7a   : > { %261 = vadd.xlane.f32.xlu0 %v248_v17 }
  0x7e   : > { %272 = vadd.xlane.f32.xlu0 %v253_v18 }
 0x107   : > { %v262_v19 = vpop.xlane.xlu0 %261 }
 0x108   : > { %v263_v20 = vrot.slane %v262_v19, 4 }
 0x10a   : > { %v264_v21 = vadd.f32 %v263_v20, %v262_v19 }
 0x10b   : > { %v273_v22 = vpop.xlane.xlu0 %272 }
 0x10c   : > { %v265_v23 = vrot.slane %v264_v21, 2  ;;  %v274_v24 = vrot.slane %v273_v22, 4 }
 0x10e   : > { %v275_v25 = vadd.f32 %v274_v24, %v273_v22  ;;  %v266_v26 = vadd.f32 %v265_v23, %v264_v21 }
 0x110   : > { %v276_v27 = vrot.slane %v275_v25, 2  ;;  %v267_v28 = vrot.slane %v266_v26, 1 }
 0x112   : > { %v277_v29 = vadd.f32 %v276_v27, %v275_v25  ;;  %v268_v30 = vadd.f32 %v267_v28, %v266_v26 }
 0x114   : > { %428 = vpush %v268_v30  ;;  %v278_v31 = vrot.slane %v277_v29, 1 }
 0x116   : > { %v279_v32 = vadd.f32 %v278_v31, %v277_v29 }
 0x118   : > { %430 = vpush %v279_v32 }
 0x145   : > { %s429_s21 = spop %428 }
 0x146   : > { %v270_v35 = vstv %s429_s21 }
 0x147   : > { %v282_v36 = vmul.f32 2.0, %v270_v35 }
 0x149   : > { %s431_s26 = spop %430  ;;  %v283_v37 = vadd.f32 1.0, %v282_v36 }
 0x14a   : > { %v281_v33 = vstv %s431_s26 }
 0x14b   : > { %v284_v34 = vadd.f32 1.0, %v281_v33 }
 0x14d   : > { %506 = vrcp.f32 %v284_v34 }
 0x157   : > { %v507_v38 = vpop.eup %506 }
 0x158   : > { %v286_v39 = vmul.f32 %v507_v38, %v283_v37 }
 0x15a   : > { %287 = vst [vmem:[%s217_s6] sm:$0xff] %v286_v39 }
 0x15b   : > { %581 = shalt.err (!%p578_p9)
}
 0x15c   : > { %s582_s16 = scalar_lea.hbm %s850_s25, 128  ;;  %s586_s5 = scalar_lea.hbm %s901_s2, 256 }
 0x15d   : > { %p583_p1 = scmp.ne.s32.totalorder %s850_s25, %s582_s16  ;;  %p587_p5 = scmp.lt.u32.totalorder %s850_s25, %s901_s2 }
 0x15e   : > { %p588_p13 = scmp.lt.u32.totalorder %s586_s5, %s582_s16  ;;  %p590_p8 = scmp.lt.u32.totalorder %s582_s16, %s850_s25 }
 0x15f   : > { %p584_p6 = pnand %p583_p1, %p913_p0 }
 0x160   : > { %p589_p3 = por %p588_p13, %p587_p5 }
 0x161   : > { %p585_p2 = pneg %p584_p6 }
 0x162   : > { %p591_p11 = por %p590_p8, %p589_p3 }
 0x164   : > { %p592_p4 = pnand %p591_p11, %p585_p2 }
 0x166   : > { %595 = shalt.err (!%p592_p4)
}
 0x167   : > { %436 = dma.vmem_to_hbm [thread:$0]  (%p913_p0), %s852_s28, 128, %s850_s25, %s289_s7  }
 0x168 PF: > { %s314_s21 = sand.u32 1, %s634_s9   ;;  %p914_p7 = scmp.ne.s32.totalorder %s907_s24, 0 }
 0x169   : > { %p915_p10 = scmp.ge.s32.totalorder %s654_s14, 2  ;;  %s315_s26 = scalar_lea.sflag [#allocation6], %s314_s21 }
 0x16b   : > { %p446_p12 = pnand %p915_p10, %p914_p7 }
 0x16d   : > { %629 = dma.done.wait (!%p446_p12), %s315_s26, 128  }
 0x16e   : > { %631 = vsyncadd (!%p446_p12), %s315_s26, 4294967168  ;;  %s21_s14 = sadd.s32 1, %s654_s14   ;;  %s916_s9 = smov %s638_s10 }
 0x16f   : > { %p18_p9 = scmp.ge.s32.totalorder %s21_s14, 4   ;;  %s917_s10 = smov %s642_s11 }
 0x170   : > { %s918_s11 = smov %s733_s23  ;;  %s919_s12 = smov %s650_s13 }
 0x171   : > { %s920_s13 = smov %s922_s17  ;;  %20 = sbr.rel (!%p18_p9) target bundleno = 8 (0x8), region = 94 }
 0x178   :  { %320 = vsyncpa [#allocation5], 1 }
 0x179   :  { %322 = vsyncpa [#allocation5 + $0x1], 1 }
 0x17a   :  { %323 = vsyncpa [#allocation8], 1 }
 0x17b   :  { %325 = vsyncpa [#allocation8 + $0x1], 1 }
 0x17c   :  { %326 = vsyncpa [#allocation6], 1 }
 0x17d   :  { %328 = vsyncpa [#allocation6 + $0x1], 1 }

</bundles_post_ra>
